<compile_context>
chip_gen: v7x
topology: tpu7x:2x2x1
jax: 0.10.0
libtpu: 0.0.40
codegen_flags: <defaults>
</compile_context>

<pallas_src>
import functools

import jax
import jax.numpy as jnp
from jax.experimental import pallas as pl
from jax.experimental.pallas import tpu as pltpu

BN_EPS = 1e-5
LANE = 128


def _round_up(x, m):
    return ((x + m - 1) // m) * m


def _resident_spec(shape):
    """Constant-index (VMEM-resident) BlockSpec, single-buffered when supported."""
    index_map = lambda l, _n=len(shape): (0,) * _n
    try:
        return pl.BlockSpec(shape, index_map, pipeline_mode=pl.Buffered(1))
    except TypeError:  # older jax without pipeline_mode / Buffered
        return pl.BlockSpec(shape, index_map)


def _encoder_fused_kernel(alpha_ref, a_ref, x_ref, mask_ref, w_ref, p_ref,
                          o_ref, act_ref, *, n_real, apply_mask):
    """One grid step == one encoder layer: GCNConv + BatchNorm1d(train) + PReLU.

    alpha_ref: (L,)            SMEM  per-layer PReLU slope
    a_ref:     (N_pad, N_pad)  bf16  dense normalized adjacency (resident, 1-buffered)
    x_ref:     (N_pad, F_pad)  bf16  input node features (used at layer 0)
    mask_ref:  (N_pad, 1)      f32   1.0 for real node rows, 0.0 for padding
    w_ref:     (F_pad, F_pad)  bf16  this layer's GCN weight (streamed)
    p_ref:     (8, F_pad)      f32   packed [bias; gamma; beta; 0...] (streamed)
    o_ref:     (N_pad, F_pad)  f32   output (written on the last layer only)
    act_ref:   (N_pad, F_pad)  bf16  VMEM scratch: activation carried across layers
    """
    layer = pl.program_id(0)
    last = pl.num_programs(0) - 1

    # Layer 0: seed the resident bf16 activation with the input features.
    @pl.when(layer == 0)
    def _():
        act_ref[...] = x_ref[...]

    bias = p_ref[0:1, :]
    gamma = p_ref[1:2, :]
    beta = p_ref[2:3, :]

    # GCNConv: transform then aggregate.  Both matmuls use bf16 MXU inputs with
    # f32 accumulation.
    xw = jnp.dot(act_ref[...], w_ref[...], preferred_element_type=jnp.float32)
    h = jnp.dot(a_ref[...], xw.astype(jnp.bfloat16),
                preferred_element_type=jnp.float32) + bias

    # BatchNorm1d, training mode: biased stats over the *real* node rows only,
    # eps=1e-5, all in f32.  1/N is a compile-time reciprocal; rsqrt -> EUP.
    inv_n = 1.0 / float(n_real)
    if apply_mask:
        rmask = mask_ref[...]                              # (N_pad, 1), lane-broadcast
        mean = jnp.sum(h * rmask, axis=0, keepdims=True) * inv_n
        diff = (h - mean) * rmask
    else:  # trace-time specialization: no padded rows -> no masking work at all
        mean = jnp.sum(h, axis=0, keepdims=True) * inv_n
        diff = h - mean
    var = jnp.sum(diff * diff, axis=0, keepdims=True) * inv_n
    hn = diff * jax.lax.rsqrt(var + BN_EPS)                # reuse masked diff
    hn = hn * gamma + beta

    # PReLU with a single shared per-layer slope.
    alpha = alpha_ref[layer]
    out = jnp.where(hn > 0, hn, alpha * hn)

    act_ref[...] = out.astype(jnp.bfloat16)                # bf16 inter-layer carry

    @pl.when(layer == last)
    def _():
        o_ref[...] = out                                   # single f32 store


def encoder_pallas(a_bf16, x_bf16, mask, w_stack, pgb_stack, alpha_stack, *,
                   n_real):
    """Fused multi-layer encoder forward on padded, packed operands."""
    n_layers, f_pad, _ = w_stack.shape
    n_pad = x_bf16.shape[0]
    apply_mask = (n_real != n_pad)

    flops = n_layers * (2 * n_pad * f_pad * f_pad + 2 * n_pad * n_pad * f_pad)
    bytes_accessed = (a_bf16.size * 2 + x_bf16.size * 2 + mask.size * 4 +
                      w_stack.size * 2 + pgb_stack.size * 4 +
                      n_pad * f_pad * 4)
    cost = pl.CostEstimate(flops=int(flops),
                           transcendentals=int(n_layers * f_pad),
                           bytes_accessed=int(bytes_accessed))

    # VMEM budget matching the buffering requested below: single-buffered
    # residents (A, X, mask), double-buffered W / packed params, one f32 output
    # block, one bf16 activation scratch, plus compiler headroom.  Clamp to the
    # chip's real VMEM capacity (v7x: 64 MiB/TC) with ~20% headroom.
    need = (a_bf16.size * 2 + x_bf16.size * 2 + mask.size * 4 +
            2 * (f_pad * f_pad * 2) + 2 * (8 * f_pad * 4) +
            n_pad * f_pad * 4 + n_pad * f_pad * 2 + (4 << 20))
    try:
        vmem_cap = int(pltpu.get_tpu_info().vmem_capacity_bytes)
    except Exception:
        vmem_cap = 64 << 20  # conservative fallback (v7x per-TC VMEM)
    vmem_limit = int(min(max(32 << 20, need), int(vmem_cap * 0.8)))

    kernel = functools.partial(_encoder_fused_kernel, n_real=n_real,
                               apply_mask=apply_mask)
    return pl.pallas_call(
        kernel,
        out_shape=jax.ShapeDtypeStruct((n_pad, f_pad), jnp.float32),
        grid=(n_layers,),
        in_specs=[
            pl.BlockSpec(memory_space=pltpu.SMEM),                    # alpha (L,)
            _resident_spec((n_pad, n_pad)),                           # A_norm bf16
            _resident_spec((n_pad, f_pad)),                           # X bf16
            _resident_spec((n_pad, 1)),                               # row mask f32
            pl.BlockSpec((None, f_pad, f_pad), lambda l: (l, 0, 0)),  # W[l]
            pl.BlockSpec((None, 8, f_pad), lambda l: (l, 0, 0)),      # [b;g;beta][l]
        ],
        out_specs=pl.BlockSpec((n_pad, f_pad), lambda l: (0, 0)),
        scratch_shapes=[pltpu.VMEM((n_pad, f_pad), jnp.bfloat16)],
        compiler_params=pltpu.CompilerParams(
            dimension_semantics=("arbitrary",),
            vmem_limit_bytes=vmem_limit),
        cost_estimate=cost,
    )(alpha_stack, a_bf16, x_bf16, mask, w_stack, pgb_stack)


def build_norm_adj(edge_index, edge_weight, num_nodes):
    """Dense GCN-normalized adjacency with self-loops (plain-JAX glue)."""
    src = edge_index[0]
    dst = edge_index[1]
    if edge_weight is None:
        edge_weight = jnp.ones(src.shape[0], dtype=jnp.float32)
    loop = jnp.arange(num_nodes, dtype=src.dtype)
    src = jnp.concatenate([src, loop])
    dst = jnp.concatenate([dst, loop])
    ew = jnp.concatenate([edge_weight, jnp.ones(num_nodes, dtype=jnp.float32)])
    deg = jnp.zeros((num_nodes,), jnp.float32).at[dst].add(ew)
    dinv = jnp.where(deg > 0, jax.lax.rsqrt(deg), 0.0)
    norm = dinv[src] * ew * dinv[dst]
    # out[dst] += norm * x[src]  =>  A[dst, src] = norm
    return jnp.zeros((num_nodes, num_nodes), jnp.float32).at[dst, src].add(norm)


def pack_params(params, f_pad):
    """Zero-pad per-layer params to a common 128-lane width and stack them.

    bias / gamma / beta are packed into one (L, 8, f_pad) tensor (rows 0/1/2,
    remaining sublanes zero) so each layer needs a single param DMA.  Zero
    padded gamma/beta/W columns keep padded feature columns exactly zero.
    """
    n_layers = len(params)
    w_stack = jnp.zeros((n_layers, f_pad, f_pad), jnp.float32)
    pgb_stack = jnp.zeros((n_layers, 8, f_pad), jnp.float32)
    alpha_stack = jnp.zeros((n_layers,), jnp.float32)
    for l, (w, b, gamma, beta, alpha) in enumerate(params):
        f_in, f_out = w.shape
        w_stack = w_stack.at[l, :f_in, :f_out].set(w)
        pgb_stack = pgb_stack.at[l, 0, :f_out].set(b[0])
        pgb_stack = pgb_stack.at[l, 1, :f_out].set(gamma[0])
        pgb_stack = pgb_stack.at[l, 2, :f_out].set(beta[0])
        alpha_stack = alpha_stack.at[l].set(alpha[0])
    return w_stack.astype(jnp.bfloat16), pgb_stack, alpha_stack


def init_encoder_params(layer_config, key):
    """Deterministic parameter init matching the module's shapes."""
    params = []
    for i in range(1, len(layer_config)):
        f_in, f_out = layer_config[i - 1], layer_config[i]
        key, wk = jax.random.split(key)
        limit = (6.0 / (f_in + f_out)) ** 0.5
        w = jax.random.uniform(wk, (f_in, f_out), jnp.float32, -limit, limit)
        b = jnp.zeros((1, f_out), jnp.float32)
        gamma = jnp.ones((1, f_out), jnp.float32)   # BatchNorm1d weight
        beta = jnp.zeros((1, f_out), jnp.float32)   # BatchNorm1d bias
        alpha = jnp.full((1,), 0.25, jnp.float32)   # PReLU init
        params.append((w, b, gamma, beta, alpha))
    return params


@functools.partial(jax.jit, static_argnames=("num_nodes",))
def encoder_forward(x, edge_index, params, num_nodes):
    # Pad nodes to a multiple of 128 (lane-dense A, MXU-filling contraction)
    # and features to a common 128-lane width.
    n_pad = _round_up(num_nodes, LANE)
    f_dims = [x.shape[1]] + [w.shape[1] for (w, *_rest) in params]
    f_pad = _round_up(max(f_dims + [LANE]), LANE)

    a = build_norm_adj(edge_index, None, num_nodes)
    a_bf16 = (jnp.zeros((n_pad, n_pad), jnp.float32)
              .at[:num_nodes, :num_nodes].set(a)).astype(jnp.bfloat16)

    x_bf16 = (jnp.zeros((n_pad, f_pad), jnp.float32)
              .at[:num_nodes, :x.shape[1]].set(x)).astype(jnp.bfloat16)

    mask = (jnp.arange(n_pad, dtype=jnp.int32) < num_nodes
            ).astype(jnp.float32).reshape(n_pad, 1)

    w_s, pgb_s, al_s = pack_params(params, f_pad)
    out_pad = encoder_pallas(a_bf16, x_bf16, mask, w_s, pgb_s, al_s,
                             n_real=num_nodes)
    f_last = params[-1][0].shape[1]
    return out_pad[:num_nodes, :f_last]


def encoder_reference(x, edge_index, params, num_nodes, use_bf16=True):
    """Pure-JAX reference. use_bf16=True mirrors the kernel's MXU-input casts."""
    a = build_norm_adj(edge_index, None, num_nodes)
    a_m = a.astype(jnp.bfloat16) if use_bf16 else a
    for (w, b, gamma, beta, alpha) in params:
        if use_bf16:
            xw = jnp.dot(x.astype(jnp.bfloat16), w.astype(jnp.bfloat16),
                         preferred_element_type=jnp.float32)
            h = jnp.dot(a_m, xw.astype(jnp.bfloat16),
                        preferred_element_type=jnp.float32) + b
        else:
            h = a_m @ (x @ w) + b
        mean = jnp.mean(h, axis=0, keepdims=True)
        var = jnp.mean((h - mean) ** 2, axis=0, keepdims=True)
        hn = (h - mean) * jax.lax.rsqrt(var + BN_EPS) * gamma + beta
        x = jnp.where(hn > 0, hn, alpha[0] * hn)
        if use_bf16:
            x = x.astype(jnp.bfloat16).astype(jnp.float32)  # mirror bf16 carry
    return x


if __name__ == "__main__":
    key = jax.random.PRNGKey(0)

    num_nodes = 32
    num_edges = 64
    layer_config = [16, 32, 32]   # Encoder(layer_config=[16, 32, 32])

    k_x, k_src, k_dst, k_param = jax.random.split(key, 4)
    x = jax.random.normal(k_x, (num_nodes, layer_config[0]), jnp.float32)
    src = jax.random.randint(k_src, (num_edges,), 0, num_nodes, jnp.int32)
    dst = jax.random.randint(k_dst, (num_edges,), 0, num_nodes, jnp.int32)
    edge_index = jnp.stack([src, dst], axis=0)

    params = init_encoder_params(layer_config, k_param)

    out = encoder_forward(x, edge_index, params, num_nodes)
    jax.block_until_ready(out)

    assert out.shape == (num_nodes, layer_config[-1])

    # Check against a reference that applies the same bf16 MXU-input casts and
    # bf16 inter-layer carry as the kernel.
    ref_matched = encoder_reference(x, edge_index, params, num_nodes, use_bf16=True)
    assert jnp.allclose(out, ref_matched, atol=1e-2, rtol=1e-2), \
        "mismatch vs bf16-matched reference"

    # Loose sanity check against the full-f32 reference (bf16 quantization only).
    ref_f32 = encoder_reference(x, edge_index, params, num_nodes, use_bf16=False)
    assert jnp.allclose(out, ref_f32, atol=2e-1, rtol=2e-1), \
        "gross mismatch vs f32 reference"

    print("KERNEL_OK")
</pallas_src>

<mosaic_0001>
module attributes {stable_mosaic.version = 11 : i64} {
  func.func private @main(%arg0: i32) attributes {dimension_semantics = [#tpu.dimension_semantics<core_parallel>], iteration_bounds = array<i64: 2>, tpu.core_type = #tpu.core_type<sc_scalar_subcore>, window_params = []} {
    return
  }
}

module attributes {stable_mosaic.version = 11 : i64} {
  func.func private @main(%arg0: i32) attributes {dimension_semantics = [#tpu.dimension_semantics<core_parallel>], iteration_bounds = array<i64: 2>, tpu.core_type = #tpu.core_type<sc_scalar_subcore>, window_params = []} {
    return
  }
}

module attributes {stable_mosaic.version = 11 : i64} {
  func.func @_encoder_fused_kernel(%arg0: i32, %arg1: memref<2xf32, #tpu.memory_space<smem>>, %arg2: memref<128x128xbf16, #tpu.memory_space<vmem>>, %arg3: memref<128x128xbf16, #tpu.memory_space<vmem>>, %arg4: memref<128x1xf32, #tpu.memory_space<vmem>>, %arg5: memref<1x128x128xbf16, #tpu.memory_space<vmem>>, %arg6: memref<1x8x128xf32, #tpu.memory_space<vmem>>, %arg7: memref<128x128xf32, #tpu.memory_space<vmem>>, %arg8: memref<128x128xbf16, #tpu.memory_space<vmem>>) attributes {dimension_semantics = [#tpu.dimension_semantics<arbitrary>], iteration_bounds = array<i64: 2>, scalar_prefetch = 0 : i64, scratch_operands = 1 : i64, tpu.core_type = #tpu.core_type<tc>, window_params = [{transform_indices = @transform_0, window_bounds = array<i64: 2>}, {pipeline_mode = #tpu.pipeline_mode<synchronous>, transform_indices = @transform_1, window_bounds = array<i64: 128, 128>}, {pipeline_mode = #tpu.pipeline_mode<synchronous>, transform_indices = @transform_2, window_bounds = array<i64: 128, 128>}, {pipeline_mode = #tpu.pipeline_mode<synchronous>, transform_indices = @transform_3, window_bounds = array<i64: 128, 1>}, {transform_indices = @transform_4, window_bounds = array<i64: 1, 128, 128>}, {transform_indices = @transform_5, window_bounds = array<i64: 1, 8, 128>}, {pipeline_mode = #tpu.pipeline_mode<synchronous>, transform_indices = @transform_6, window_bounds = array<i64: 128, 128>}]} {
    %c0_i32 = arith.constant 0 : i32
    %0 = arith.cmpi eq, %arg0, %c0_i32 : i32
    %1 = arith.extui %0 : i1 to i32
    %c0_i32_0 = arith.constant 0 : i32
    %2 = arith.cmpi ne, %1, %c0_i32_0 : i32
    scf.if %2 {
      %c0_26 = arith.constant 0 : index
      %c0_27 = arith.constant 0 : index
      %55 = vector.load %arg3[%c0_26, %c0_27] : memref<128x128xbf16, #tpu.memory_space<vmem>>, vector<128x128xbf16>
      %c0_28 = arith.constant 0 : index
      %c0_29 = arith.constant 0 : index
      %56 = vector.load %arg8[%c0_28, %c0_29] : memref<128x128xbf16, #tpu.memory_space<vmem>>, vector<128x128xbf16>
      tpu.vector_store %arg8[%c0_28, %c0_29], %55 {strides = array<i32>} : memref<128x128xbf16, #tpu.memory_space<vmem>>, vector<128x128xbf16>,
    } else {
    }
    %c0 = arith.constant 0 : index
    %c0_1 = arith.constant 0 : index
    %c0_2 = arith.constant 0 : index
    %3 = vector.load %arg6[%c0, %c0_1, %c0_2] : memref<1x8x128xf32, #tpu.memory_space<vmem>>, vector<1x1x128xf32>
    %4 = vector.shape_cast %3 : vector<1x1x128xf32> to vector<1x128xf32>
    %c0_3 = arith.constant 0 : index
    %c1 = arith.constant 1 : index
    %c0_4 = arith.constant 0 : index
    %5 = vector.load %arg6[%c0_3, %c1, %c0_4] : memref<1x8x128xf32, #tpu.memory_space<vmem>>, vector<1x1x128xf32>
    %6 = vector.shape_cast %5 : vector<1x1x128xf32> to vector<1x128xf32>
    %c0_5 = arith.constant 0 : index
    %c2 = arith.constant 2 : index
    %c0_6 = arith.constant 0 : index
    %7 = vector.load %arg6[%c0_5, %c2, %c0_6] : memref<1x8x128xf32, #tpu.memory_space<vmem>>, vector<1x1x128xf32>
    %8 = vector.shape_cast %7 : vector<1x1x128xf32> to vector<1x128xf32>
    %c0_7 = arith.constant 0 : index
    %c0_8 = arith.constant 0 : index
    %9 = vector.load %arg8[%c0_7, %c0_8] : memref<128x128xbf16, #tpu.memory_space<vmem>>, vector<128x128xbf16>
    %c0_9 = arith.constant 0 : index
    %c0_10 = arith.constant 0 : index
    %c0_11 = arith.constant 0 : index
    %10 = vector.load %arg5[%c0_9, %c0_10, %c0_11] : memref<1x128x128xbf16, #tpu.memory_space<vmem>>, vector<1x128x128xbf16>
    %11 = vector.shape_cast %10 : vector<1x128x128xbf16> to vector<128x128xbf16>
    %cst = arith.constant dense<0.000000e+00> : vector<128x128xf32>
    %12 = tpu.matmul %9, %11, %cst {dimension_numbers = #tpu.dot_dimension_numbers<[1], [0], [0], [1], [0, 0, 1, 1], [], []>} : vector<128x128xbf16>, vector<128x128xbf16>, vector<128x128xf32> -> vector<128x128xf32>
    %c0_12 = arith.constant 0 : index
    %c0_13 = arith.constant 0 : index
    %13 = vector.load %arg2[%c0_12, %c0_13] : memref<128x128xbf16, #tpu.memory_space<vmem>>, vector<128x128xbf16>
    %14 = arith.truncf %12 : vector<128x128xf32> to vector<128x128xbf16>
    %cst_14 = arith.constant dense<0.000000e+00> : vector<128x128xf32>
    %15 = tpu.matmul %13, %14, %cst_14 {dimension_numbers = #tpu.dot_dimension_numbers<[1], [0], [0], [1], [0, 0, 1, 1], [], []>} : vector<128x128xbf16>, vector<128x128xbf16>, vector<128x128xf32> -> vector<128x128xf32>
    %16 = vector.broadcast %4 : vector<1x128xf32> to vector<128x128xf32>
    %17 = arith.addf %15, %16 : vector<128x128xf32>
    %c0_15 = arith.constant 0 : index
    %c0_16 = arith.constant 0 : index
    %18 = vector.load %arg4[%c0_15, %c0_16] : memref<128x1xf32, #tpu.memory_space<vmem>>, vector<128x1xf32>
    %19 = vector.broadcast %18 : vector<128x1xf32> to vector<128x128xf32>
    %20 = arith.mulf %17, %19 : vector<128x128xf32>
    %cst_17 = arith.constant dense<0.000000e+00> : vector<128xf32>
    %21 = vector.multi_reduction <add>, %20, %cst_17 [0] : vector<128x128xf32> to vector<128xf32>
    %22 = vector.shape_cast %21 : vector<128xf32> to vector<1x128xf32>
    %cst_18 = arith.constant 3.125000e-02 : f32
    %23 = vector.broadcast %cst_18 : f32 to vector<1x128xf32>
    %24 = arith.mulf %22, %23 : vector<1x128xf32>
    %25 = vector.broadcast %24 : vector<1x128xf32> to vector<128x128xf32>
    %26 = arith.subf %17, %25 : vector<128x128xf32>
    %27 = vector.broadcast %18 : vector<128x1xf32> to vector<128x128xf32>
    %28 = arith.mulf %26, %27 : vector<128x128xf32>
    %29 = arith.mulf %28, %28 : vector<128x128xf32>
    %cst_19 = arith.constant dense<0.000000e+00> : vector<128xf32>
    %30 = vector.multi_reduction <add>, %29, %cst_19 [0] : vector<128x128xf32> to vector<128xf32>
    %31 = vector.shape_cast %30 : vector<128xf32> to vector<1x128xf32>
    %cst_20 = arith.constant 3.125000e-02 : f32
    %32 = vector.broadcast %cst_20 : f32 to vector<1x128xf32>
    %33 = arith.mulf %31, %32 : vector<1x128xf32>
    %cst_21 = arith.constant 9.99999974E-6 : f32
    %34 = vector.broadcast %cst_21 : f32 to vector<1x128xf32>
    %35 = arith.addf %33, %34 : vector<1x128xf32>
    %36 = math.rsqrt %35 : vector<1x128xf32>
    %37 = vector.broadcast %36 : vector<1x128xf32> to vector<128x128xf32>
    %38 = arith.mulf %28, %37 : vector<128x128xf32>
    %39 = vector.broadcast %6 : vector<1x128xf32> to vector<128x128xf32>
    %40 = arith.mulf %38, %39 : vector<128x128xf32>
    %41 = vector.broadcast %8 : vector<1x128xf32> to vector<128x128xf32>
    %42 = arith.addf %40, %41 : vector<128x128xf32>
    %43 = arith.index_cast %arg0 : i32 to index
    %44 = memref.load %arg1[%43] : memref<2xf32, #tpu.memory_space<smem>>
    %cst_22 = arith.constant 0.000000e+00 : f32
    %45 = vector.broadcast %cst_22 : f32 to vector<128x128xf32>
    %46 = arith.cmpf ogt, %42, %45 : vector<128x128xf32>
    %47 = vector.broadcast %44 : f32 to vector<128x128xf32>
    %48 = arith.mulf %47, %42 : vector<128x128xf32>
    %49 = arith.select %46, %42, %48 : vector<128x128xi1>, vector<128x128xf32>
    %50 = arith.truncf %49 : vector<128x128xf32> to vector<128x128xbf16>
    %c0_23 = arith.constant 0 : index
    %c0_24 = arith.constant 0 : index
    %51 = vector.load %arg8[%c0_23, %c0_24] : memref<128x128xbf16, #tpu.memory_space<vmem>>, vector<128x128xbf16>
    tpu.vector_store %arg8[%c0_23, %c0_24], %50 {strides = array<i32>} : memref<128x128xbf16, #tpu.memory_space<vmem>>, vector<128x128xbf16>,
    %c1_i32 = arith.constant 1 : i32
    %52 = arith.cmpi eq, %arg0, %c1_i32 : i32
    %53 = arith.extui %52 : i1 to i32
    %c0_i32_25 = arith.constant 0 : i32
    %54 = arith.cmpi ne, %53, %c0_i32_25 : i32
    scf.if %54 {
      %c0_26 = arith.constant 0 : index
      %c0_27 = arith.constant 0 : index
      %55 = vector.load %arg7[%c0_26, %c0_27] : memref<128x128xf32, #tpu.memory_space<vmem>>, vector<128x128xf32>
      tpu.vector_store %arg7[%c0_26, %c0_27], %49 {strides = array<i32>} : memref<128x128xf32, #tpu.memory_space<vmem>>, vector<128x128xf32>,
    } else {
    }
    return
  }
  func.func @transform_0(%arg0: i32) -> i32 {
    %c0_i32 = arith.constant 0 : i32
    %c0_i32_0 = arith.constant 0 : i32
    return %c0_i32 : i32
  }
  func.func @transform_1(%arg0: i32) -> (i32, i32) {
    %c0_i32 = arith.constant 0 : i32
    %c0_i32_0 = arith.constant 0 : i32
    %c0_i32_1 = arith.constant 0 : i32
    return %c0_i32, %c0_i32_0 : i32, i32
  }
  func.func @transform_2(%arg0: i32) -> (i32, i32) {
    %c0_i32 = arith.constant 0 : i32
    %c0_i32_0 = arith.constant 0 : i32
    %c0_i32_1 = arith.constant 0 : i32
    return %c0_i32, %c0_i32_0 : i32, i32
  }
  func.func @transform_3(%arg0: i32) -> (i32, i32) {
    %c0_i32 = arith.constant 0 : i32
    %c0_i32_0 = arith.constant 0 : i32
    %c0_i32_1 = arith.constant 0 : i32
    return %c0_i32, %c0_i32_0 : i32, i32
  }
  func.func @transform_4(%arg0: i32) -> (i32, i32, i32) {
    %c0_i32 = arith.constant 0 : i32
    %c0_i32_0 = arith.constant 0 : i32
    %c0_i32_1 = arith.constant 0 : i32
    return %arg0, %c0_i32, %c0_i32_0 : i32, i32, i32
  }
  func.func @transform_5(%arg0: i32) -> (i32, i32, i32) {
    %c0_i32 = arith.constant 0 : i32
    %c0_i32_0 = arith.constant 0 : i32
    %c0_i32_1 = arith.constant 0 : i32
    return %arg0, %c0_i32, %c0_i32_0 : i32, i32, i32
  }
  func.func @transform_6(%arg0: i32) -> (i32, i32) {
    %c0_i32 = arith.constant 0 : i32
    %c0_i32_0 = arith.constant 0 : i32
    %c0_i32_1 = arith.constant 0 : i32
    return %c0_i32, %c0_i32_0 : i32, i32
  }
}

</mosaic_0001>

<bundles_post_ra>
// kernel: mul.1
= control target key start
LH: loop header
LB: loop body
LE: loop exit
PB: predicated region body
PF: predicated region fallthrough
CT: control target
= control target key end

     0   :  { %s34_s0 = inlined_call_operand.vmem [shape: f32[96], index: 0, kind: input, shape index: {}]   ;;  %s35_s1 = inlined_call_operand.vmem [shape: f32[96], index: 1, kind: input, shape index: {}]   ;;  %s36_s2 = inlined_call_operand.vmem [shape: f32[96], index: 2, kind: output, shape index: {}]  }
   0x1   :  { %v3_v0 = vld [vmem:[%s34_s0] sm:$0x1] }
   0x2   :  { %v4_v1 = vld [vmem:[%s35_s1] sm:$0x1] }
   0x3   :  { %v7_v2 = vmul.f32 %v4_v1, %v3_v0 }
   0x5   :  { %9 = vst [vmem:[%s36_s2] sm:$0x1] %v7_v2 }

// kernel: encoder_forward.1
= control target key start
LH: loop header
LB: loop body
LE: loop exit
PB: predicated region body
PF: predicated region fallthrough
CT: control target
= control target key end

     0   :  { %11 = vsyncpa [#allocation4], 0  ;;  %s1339_s21 = smov 0   ;;  %s1722_s0 = inlined_call_operand.vmem [shape: f32[2], index: 0, kind: input, shape index: {}]   ;;  %s1723_s1 = inlined_call_operand.vmem [shape: bf16[128,128], index: 1, kind: input, shape index: {}]   ;;  %s1724_s2 = inlined_call_operand.vmem [shape: bf16[128,128], index: 2, kind: input, shape index: {}]   ;;  %s1725_s3 = inlined_call_operand.vmem [shape: f32[128,1], index: 3, kind: input, shape index: {}]   ;;  %s1726_s4 = inlined_call_operand.vmem [shape: bf16[2,128,128], index: 4, kind: input, shape index: {}]   ;;  %s1727_s5 = inlined_call_operand.vmem [shape: f32[2,8,128], index: 5, kind: input, shape index: {}]   ;;  %s1728_s6 = inlined_call_operand.vmem [shape: f32[128,128], index: 6, kind: output, shape index: {}]  }
   0x1 LB: > { %s1345_s22 = sadd.s32 4294967295, %s1300_s21   ;;  %p1091_p0 = scmp.ge.s32.totalorder %s1300_s21, 1  ;;  %s1300_s21 = sphi %s1339_s21, %s17_s21  }
   0x2   : > { %p179_p1 = scmp.lt.s32.totalorder %s1300_s21, 3  ;;  %s192_s25 = sshll.u32 %s1722_s0, 4  ;;  %s193_s25 = int_to_ptr.vmem [resolvable:$true] %s192_s25 }
   0x3   : > { %p1235_p4 = scmp.eq.s32.totalorder %s1345_s22, 0  ;;  %s1275_s27 = scalar_lea.vmem %s193_s25, 16 }
   0x4   : > { %p1353_p3 = pnand %p1091_p0, %p179_p1  ;;  %p1276_p7 = scmp.ne.s32.totalorder %s193_s25, %s1275_s27 }
   0x5   : > { %p1283_p11 = scmp.lt.s32.totalorder %s193_s25, %s193_s25  ;;  %p1284_p12 = scmp.lt.s32.totalorder %s1275_s27, %s1275_s27 }
   0x6   : > { %p1231_p5 = pneg %p1353_p3 }
   0x7   : > { %p1285_p13 = por %p1284_p12, %p1283_p11 }
   0x8   : > { %p1232_p6 = pnand %p1235_p4, %p1231_p5 }
   0xa   : > { %p1277_p8 = pneg %p1232_p6 }
   0xc   : > { %p1278_p9 = pnand %p1277_p8, %p1276_p7 }
   0xe   : > { %p1279_p10 = pneg %p1278_p9 }
  0x10   : > { %p1286_p2 = pnand %p1285_p13, %p1279_p10 }
  0x12   : > { %1289 = shalt.err (!%p1286_p2)
}
  0x13   : > { %s1302_s28 = smov [#allocation3]   ;;  %229 = sbr.rel (%p1353_p3) target bundleno = 685 (0x2ad), region = 44 }
  0x14   : > { %1234 = dma.vmem_to_smem (!%p1232_p6), %s193_s25, 16, %s1302_s28, [#allocation4]  }
  0x1a   : > { %1295 = dma.done.wait (%p1235_p4), [#allocation4], 16  }
  0x1b   : > { %1297 = vsyncadd (%p1235_p4), [#allocation4], 4294967280 }
  0x1c   : > { %235 = sfence }
  0x1d   : > { %p259_p0 = scmp.lt.s32.totalorder %s1345_s22, 1  ;;  %p1730_p1 = scmp.ne.s32.totalorder %s1345_s22, 0 }
  0x1e   : > { %v1247_v0 = vld [vmem:[%s1724_s2] sm:$0xff] (!%p1730_p1)   ;;  %v1248_v1 = vld [vmem:[%s1724_s2 + $0x8] sm:$0xff] (!%p1730_p1)   ;;  %v1249_v2 = vld [vmem:[%s1724_s2 + $0x10] sm:$0xff] (!%p1730_p1)  }
  0x1f   : > { %s260_s29 = scalar_select %p259_p0, %s1345_s22, 1 }
  0x20   : > { %272 = sbr.rel (%p1730_p1) target bundleno = 39 (0x27), region = 52  ;;  %337 = vst [vmem:[#allocation2] sm:$0xff] (!%p1730_p1), %v1247_v0  ;;  %338 = vst [vmem:[#allocation2 + $0x8] sm:$0xff] (!%p1730_p1), %v1248_v1  ;;  %v1250_v3 = vld [vmem:[%s1724_s2 + $0x18] sm:$0xff] (!%p1730_p1)   ;;  %v1251_v4 = vld [vmem:[%s1724_s2 + $0x20] sm:$0xff] (!%p1730_p1)  }
  0x21   : > { %s1130_s30 = sshll.u32 %s260_s29, 6  ;;  %s1098_s7 = sshll.u32 %s260_s29, 3  ;;  %339 = vst [vmem:[#allocation2 + $0x10] sm:$0xff] (!%p1730_p1), %v1249_v2  ;;  %340 = vst [vmem:[#allocation2 + $0x18] sm:$0xff] (!%p1730_p1), %v1250_v3  ;;  %v1252_v5 = vld [vmem:[%s1724_s2 + $0x28] sm:$0xff] (!%p1730_p1)   ;;  %v1253_v6 = vld [vmem:[%s1724_s2 + $0x30] sm:$0xff] (!%p1730_p1)  }
  0x22   : > { %s1373_s10 = scalar_lea.vmem %s1726_s4, %s1130_s30  ;;  %s1378_s13 = scalar_lea.vmem %s1727_s5, %s1098_s7  ;;  %341 = vst [vmem:[#allocation2 + $0x20] sm:$0xff] (!%p1730_p1), %v1251_v4  ;;  %342 = vst [vmem:[#allocation2 + $0x28] sm:$0xff] (!%p1730_p1), %v1252_v5  ;;  %v1254_v7 = vld [vmem:[%s1724_s2 + $0x38] sm:$0xff] (!%p1730_p1)  }
  0x23   : > { %343 = vst [vmem:[#allocation2 + $0x30] sm:$0xff] (!%p1730_p1), %v1253_v6  ;;  %344 = vst [vmem:[#allocation2 + $0x38] sm:$0xff] (!%p1730_p1), %v1254_v7 }
  0x27 PF: > { %v1257_v8 = vld [vmem:[%s1373_s10] sm:$0xff]   ;;  %v1258_v9 = vld [vmem:[%s1373_s10 + $0x8] sm:$0xff]   ;;  %v1259_v10 = vld [vmem:[%s1373_s10 + $0x10] sm:$0xff]   ;;  %v1303_v27 = vmov 0   ;;  %s952_s15 = sld [smem:[#allocation3 + %s1345_s22]]  ;;  %p1127_p2 = scmp.ne.s32.totalorder %s1345_s22, 1 }
  0x28   : > { %1163 = vmatprep.subr.bf16.mxu0 %v1257_v8  ;;  %v1260_v11 = vld [vmem:[%s1373_s10 + $0x18] sm:$0xff]   ;;  %v348_v12 = vld [vmem:[#allocation2] sm:$0xff]  ;;  %v1262_v14 = vld [vmem:[%s1373_s10 + $0x28] sm:$0xff]   ;;  %1255 = vset.pattern.permute.xlu0 %v1303_v27 }
  0x29   : > { %1164 = vmatpush3.bf16.msra.mxu0 %v1257_v8  ;;  %1179 = vmatprep.mubr.bf16.mxu0 %v348_v12  ;;  %v1261_v13 = vld [vmem:[%s1373_s10 + $0x20] sm:$0xff]   ;;  %v1263_v15 = vld [vmem:[%s1373_s10 + $0x30] sm:$0xff]   ;;  %v1264_v16 = vld [vmem:[%s1373_s10 + $0x38] sm:$0xff]  }
  0x2a   : > { %1165 = vmatprep.subr.bf16.mxu0 %v1258_v9  ;;  %v349_v17 = vld [vmem:[#allocation2 + $0x8] sm:$0xff]  ;;  %v350_v18 = vld [vmem:[#allocation2 + $0x10] sm:$0xff]  ;;  %v351_v19 = vld [vmem:[#allocation2 + $0x18] sm:$0xff]  ;;  %1256 = vset.pattern.permute.xlu1 %v1303_v27 }
  0x2b   : > { %v352_v20 = vld [vmem:[#allocation2 + $0x20] sm:$0xff]  ;;  %v353_v21 = vld [vmem:[#allocation2 + $0x28] sm:$0xff]  ;;  %v354_v22 = vld [vmem:[#allocation2 + $0x30] sm:$0xff] }
  0x2c   : > { %v355_v23 = vld [vmem:[#allocation2 + $0x38] sm:$0xff]  ;;  %v1265_v24 = vld [vmem:[%s1723_s1] sm:$0xff]   ;;  %v692_v26 = vld [vmem:[%s1725_s3 + $0x10] sm:$0xff] }
  0x2d   : > { %1166 = vmatpush3.bf16.msra.mxu0 %v1258_v9  ;;  %1211 = vmatprep.mubr.bf16.mxu1 %v1265_v24  ;;  %v690_v25 = vld [vmem:[%s1725_s3] sm:$0xff]  ;;  %v691_v28 = vld [vmem:[%s1725_s3 + $0x8] sm:$0xff]  ;;  %v693_v29 = vld [vmem:[%s1725_s3 + $0x18] sm:$0xff] }
  0x2e   : > { %1167 = vmatprep.subr.bf16.mxu0 %v1259_v10  ;;  %708 = vperm.xlu0 %1255, %v690_v25   ;;  %v694_v30 = vld [vmem:[%s1725_s3 + $0x20] sm:$0xff]  ;;  %v695_v31 = vld [vmem:[%s1725_s3 + $0x28] sm:$0xff]  ;;  %v696_v32 = vld [vmem:[%s1725_s3 + $0x30] sm:$0xff] }
  0x2f   : > { %718 = vperm.xlu1 %1256, %v692_v26   ;;  %v697_v33 = vld [vmem:[%s1725_s3 + $0x38] sm:$0xff]  ;;  %v698_v34 = vld [vmem:[%s1725_s3 + $0x40] sm:$0xff]  ;;  %v699_v35 = vld [vmem:[%s1725_s3 + $0x48] sm:$0xff] }
  0x30   : > { %v700_v36 = vld [vmem:[%s1725_s3 + $0x50] sm:$0xff]  ;;  %v701_v37 = vld [vmem:[%s1725_s3 + $0x58] sm:$0xff]  ;;  %v702_v38 = vld [vmem:[%s1725_s3 + $0x60] sm:$0xff] }
  0x31   : > { %1168 = vmatpush3.bf16.msra.mxu0 %v1259_v10  ;;  %v703_v39 = vld [vmem:[%s1725_s3 + $0x68] sm:$0xff]  ;;  %v704_v40 = vld [vmem:[%s1725_s3 + $0x70] sm:$0xff]  ;;  %v705_v41 = vld [vmem:[%s1725_s3 + $0x78] sm:$0xff] }
  0x32   : > { %1169 = vmatprep.subr.bf16.mxu0 %v1260_v11  ;;  %713 = vperm.xlu0 %1255, %v691_v28   ;;  %v1266_v2 = vld [vmem:[%s1723_s1 + $0x8] sm:$0xff]   ;;  %v1267_v3 = vld [vmem:[%s1723_s1 + $0x10] sm:$0xff]   ;;  %v1268_v4 = vld [vmem:[%s1723_s1 + $0x18] sm:$0xff]  }
  0x33   : > { %723 = vperm.xlu1 %1256, %v693_v29   ;;  %v1269_v5 = vld [vmem:[%s1723_s1 + $0x20] sm:$0xff]   ;;  %v1270_v6 = vld [vmem:[%s1723_s1 + $0x28] sm:$0xff]   ;;  %v1271_v7 = vld [vmem:[%s1723_s1 + $0x30] sm:$0xff]  }
  0x34   : > { %v1272_v8 = vld [vmem:[%s1723_s1 + $0x38] sm:$0xff]  }
  0x35   : > { %1170 = vmatpush3.bf16.msra.mxu0 %v1260_v11 }
  0x36   : > { %1171 = vmatprep.subr.bf16.mxu0 %v1261_v13  ;;  %728 = vperm.xlu0 %1255, %v694_v30  }
  0x37   : > { %733 = vperm.xlu1 %1256, %v695_v31  }
  0x39   : > { %1172 = vmatpush3.bf16.msra.mxu0 %v1261_v13  ;;  %v1495_v13 = vld [vmem:[%s1378_s13] ss:$0 sm:$0xff] }
  0x3a   : > { %1173 = vmatprep.subr.bf16.mxu0 %v1262_v14  ;;  %738 = vperm.xlu0 %1255, %v696_v32  }
  0x3b   : > { %743 = vperm.xlu1 %1256, %v697_v33  }
  0x3d   : > { %1174 = vmatpush3.bf16.msra.mxu0 %v1262_v14 }
  0x3e   : > { %1175 = vmatprep.subr.bf16.mxu0 %v1263_v15  ;;  %748 = vperm.xlu0 %1255, %v698_v34  }
  0x3f   : > { %753 = vperm.xlu1 %1256, %v699_v35  }
  0x41   : > { %1176 = vmatpush3.bf16.msra.mxu0 %v1263_v15 }
  0x42   : > { %1177 = vmatprep.subr.bf16.mxu0 %v1264_v16  ;;  %758 = vperm.xlu0 %1255, %v700_v36  }
  0x43   : > { %763 = vperm.xlu1 %1256, %v701_v37  }
  0x45   : > { %1178 = vmatpush3.bf16.msra.mxu0 %v1264_v16 }
  0x46   : > { %768 = vperm.xlu0 %1255, %v702_v38  }
  0x47   : > { %773 = vperm.xlu1 %1256, %v703_v39  }
  0x48   : > { %1180 = vmatmul.mubr.bf16.vlgmr.msra.gmra.mrb[0].mxu0 %v349_v17 }
  0x49   : > { %1183 = vmatprep.mubr.bf16.mxu0 %v350_v18 }
  0x4a   : > { %778 = vperm.xlu0 %1255, %v704_v40  }
  0x4b   : > { %783 = vperm.xlu1 %1256, %v705_v41  }
  0x50   : > { %1184 = vmatmul.mubr.bf16.gmra.mrb[4].mxu0 %v351_v19 }
  0x51   : > { %1187 = vmatprep.mubr.bf16.mxu0 %v352_v20 }
  0x58   : > { %1188 = vmatmul.mubr.bf16.gmra.mrb[8].mxu0 %v353_v21 }
  0x59   : > { %1191 = vmatprep.mubr.bf16.mxu0 %v354_v22 }
  0x60   : > { %1192 = vmatmul.mubr.bf16.gmra.mrb[12].mxu0 %v355_v23 }
  0xad   : > { %v1486_v9 = vpop.permute.xlu0 %708 }
  0xae   : > { %v1488_v10 = vpop.permute.xlu1 %718 }
  0xb1   : > { %v1490_v11 = vpop.permute.xlu0 %713 }
  0xb2   : > { %v1492_v12 = vpop.permute.xlu1 %723 }
  0xb5   : > { %v1497_v15 = vpop.permute.xlu0 %728 }
  0xb6   : > { %v1502_v19 = vpop.permute.xlu1 %733 }
  0xb9   : > { %v1517_v26 = vpop.permute.xlu0 %738 }
  0xba   : > { %v1521_v30 = vpop.permute.xlu1 %743 }
  0xbd   : > { %v1536_v41 = vpop.permute.xlu0 %748 }
 0x11b   : > { %v1181_v42 = vpop.f32.mrb[0].mxu0 }
 0x11c   : > { %v454_v43 = vpop.f32.mrb[1].mxu0 }
 0x11d   : > { %v1182_v44 = vpop.f32.mrb[2].mxu0 }
 0x11e   : > { %v534_v45 = vpack.c.bf16 %v1182_v44, %v1181_v42  ;;  %v457_v46 = vpop.f32.mrb[3].mxu0 }
 0x11f   : > { %v533_v47 = vpack.c.bf16 %v457_v46, %v454_v43 }
 0x121   : > { %1195 = vmatprep.subr.bf16.mxu1 %v533_v47 }
 0x122   : > { %1196 = vmatpush3.bf16.msra.mxu1 %v533_v47 }
 0x123   : > { %v1185_v48 = vpop.f32.mrb[4].mxu0  ;;  %1197 = vmatprep.subr.bf16.mxu1 %v534_v45 }
 0x124   : > { %v470_v49 = vpop.f32.mrb[5].mxu0 }
 0x125   : > { %v1186_v50 = vpop.f32.mrb[6].mxu0 }
 0x126   : > { %v536_v51 = vpack.c.bf16 %v1186_v50, %v1185_v48  ;;  %v473_v52 = vpop.f32.mrb[7].mxu0  ;;  %1198 = vmatpush3.bf16.msra.mxu1 %v534_v45  ;;  %v1543_v45 = vpop.permute.xlu1 %753 }
 0x127   : > { %v535_v53 = vpack.c.bf16 %v473_v52, %v470_v49 }
 0x129   : > { %1199 = vmatprep.subr.bf16.mxu1 %v535_v53 }
 0x12a   : > { %1200 = vmatpush3.bf16.msra.mxu1 %v535_v53 }
 0x12b   : > { %v1189_v54 = vpop.f32.mrb[8].mxu0  ;;  %1201 = vmatprep.subr.bf16.mxu1 %v536_v51 }
 0x12c   : > { %v486_v55 = vpop.f32.mrb[9].mxu0 }
 0x12d   : > { %v1190_v56 = vpop.f32.mrb[10].mxu0 }
 0x12e   : > { %v538_v57 = vpack.c.bf16 %v1190_v56, %v1189_v54  ;;  %v489_v58 = vpop.f32.mrb[11].mxu0  ;;  %1202 = vmatpush3.bf16.msra.mxu1 %v536_v51  ;;  %v1552_v54 = vpop.permute.xlu0 %758 }
 0x12f   : > { %v537_v59 = vpack.c.bf16 %v489_v58, %v486_v55 }
 0x131   : > { %1203 = vmatprep.subr.bf16.mxu1 %v537_v59 }
 0x132   : > { %1204 = vmatpush3.bf16.msra.mxu1 %v537_v59 }
 0x133   : > { %v1193_v60 = vpop.f32.mrb[12].mxu0  ;;  %1205 = vmatprep.subr.bf16.mxu1 %v538_v57 }
 0x134   : > { %v502_v61 = vpop.f32.mrb[13].mxu0 }
 0x135   : > { %v1194_v62 = vpop.f32.mrb[14].mxu0 }
 0x136   : > { %v540_v63 = vpack.c.bf16 %v1194_v62, %v1193_v60  ;;  %v505_v0 = vpop.f32.mrb[15].mxu0  ;;  %1206 = vmatpush3.bf16.msra.mxu1 %v538_v57  ;;  %v1562_v60 = vpop.permute.xlu1 %763 }
 0x137   : > { %v539_v1 = vpack.c.bf16 %v505_v0, %v502_v61 }
 0x139   : > { %1207 = vmatprep.subr.bf16.mxu1 %v539_v1 }
 0x13a   : > { %1208 = vmatpush3.bf16.msra.mxu1 %v539_v1 }
 0x13b   : > { %1209 = vmatprep.subr.bf16.mxu1 %v540_v63 }
 0x13e   : > { %1210 = vmatpush3.bf16.msra.mxu1 %v540_v63 }
 0x141   : > { %1212 = vmatmul.mubr.bf16.vlgmr.msra.gmra.mrb[0].mxu1 %v1266_v2 }
 0x142   : > { %1215 = vmatprep.mubr.bf16.mxu1 %v1267_v3  ;;  %v1571_v3 = vpop.permute.xlu0 %768 }
 0x149   : > { %1216 = vmatmul.mubr.bf16.gmra.mrb[4].mxu1 %v1268_v4 }
 0x14a   : > { %1219 = vmatprep.mubr.bf16.mxu1 %v1269_v5 }
 0x151   : > { %1220 = vmatmul.mubr.bf16.gmra.mrb[8].mxu1 %v1270_v6 }
 0x152   : > { %1223 = vmatprep.mubr.bf16.mxu1 %v1271_v7 }
 0x159   : > { %1224 = vmatmul.mubr.bf16.gmra.mrb[12].mxu1 %v1272_v8 }
 0x214   : > { %v1213_v14 = vpop.f32.mrb[0].mxu1 }
 0x215   : > { %v627_v16 = vpop.f32.mrb[1].mxu1  ;;  %v1505_v21 = vadd.f32 %v1213_v14, %v1495_v13  ;;  %v1578_v14 = vpop.permute.xlu1 %773 }
 0x216   : > { %v1500_v17 = vadd.f32 %v1495_v13, %v627_v16  ;;  %v1214_v18 = vpop.f32.mrb[2].mxu1 }
 0x217   : > { %v630_v20 = vpop.f32.mrb[3].mxu1  ;;  %v1513_v24 = vadd.f32 %v1214_v18, %v1495_v13  ;;  %v788_v27 = vmul.f32 %v1488_v10, %v1505_v21 }
 0x218   : > { %v1508_v22 = vadd.f32 %v1495_v13, %v630_v20  ;;  %v786_v23 = vmul.f32 %v1486_v9, %v1500_v17 }
 0x219   : > { %v789_v32 = vmul.f32 %v1492_v12, %v1513_v24 }
 0x21a   : > { %v787_v25 = vmul.f32 %v1490_v11, %v1508_v22 }
 0x21c   : > { %v802_v28 = vadd.f32 %v787_v25, %v786_v23  ;;  %v1217_v29 = vpop.f32.mrb[4].mxu1 }
 0x21d   : > { %v643_v31 = vpop.f32.mrb[5].mxu1  ;;  %v1529_v37 = vadd.f32 %v1217_v29, %v1495_v13 }
 0x21e   : > { %v803_v33 = vadd.f32 %v802_v28, %v788_v27  ;;  %v1526_v34 = vadd.f32 %v1495_v13, %v643_v31  ;;  %v1218_v35 = vpop.f32.mrb[6].mxu1  ;;  %v1593_v31 = vpop.permute.xlu0 %778 }
 0x21f   : > { %v646_v36 = vpop.f32.mrb[7].mxu1  ;;  %v1539_v43 = vadd.f32 %v1218_v35, %v1495_v13  ;;  %v792_v46 = vmul.f32 %v1517_v26, %v1529_v37  ;;  %v1597_v35 = vpop.permute.xlu1 %783 }
 0x220   : > { %v790_v38 = vmul.f32 %v1497_v15, %v1526_v34  ;;  %v804_v39 = vadd.f32 %v803_v33, %v789_v32  ;;  %v1534_v40 = vadd.f32 %v1495_v13, %v646_v36 }
 0x221   : > { %v793_v50 = vmul.f32 %v1521_v30, %v1539_v43 }
 0x222   : > { %v805_v42 = vadd.f32 %v804_v39, %v790_v38  ;;  %v791_v44 = vmul.f32 %v1502_v19, %v1534_v40 }
 0x224   : > { %v806_v47 = vadd.f32 %v805_v42, %v791_v44  ;;  %v1221_v48 = vpop.f32.mrb[8].mxu1 }
 0x225   : > { %v659_v49 = vpop.f32.mrb[9].mxu1  ;;  %v1555_v56 = vadd.f32 %v1221_v48, %v1495_v13 }
 0x226   : > { %v807_v51 = vadd.f32 %v806_v47, %v792_v46  ;;  %v1550_v52 = vadd.f32 %v1495_v13, %v659_v49  ;;  %v1222_v53 = vpop.f32.mrb[10].mxu1 }
 0x227   : > { %v662_v55 = vpop.f32.mrb[11].mxu1  ;;  %v1565_v62 = vadd.f32 %v1222_v53, %v1495_v13  ;;  %v796_v0 = vmul.f32 %v1552_v54, %v1555_v56 }
 0x228   : > { %v794_v57 = vmul.f32 %v1536_v41, %v1550_v52  ;;  %v808_v58 = vadd.f32 %v807_v51, %v793_v50  ;;  %v1560_v59 = vadd.f32 %v1495_v13, %v662_v55 }
 0x229   : > { %v797_v5 = vmul.f32 %v1562_v60, %v1565_v62 }
 0x22a   : > { %v809_v61 = vadd.f32 %v808_v58, %v794_v57  ;;  %v795_v63 = vmul.f32 %v1543_v45, %v1560_v59 }
 0x22c   : > { %v810_v1 = vadd.f32 %v809_v61, %v795_v63  ;;  %v1225_v2 = vpop.f32.mrb[12].mxu1 }
 0x22d   : > { %v675_v4 = vpop.f32.mrb[13].mxu1  ;;  %v1581_v18 = vadd.f32 %v1225_v2, %v1495_v13 }
 0x22e   : > { %v811_v6 = vadd.f32 %v810_v1, %v796_v0  ;;  %v1576_v7 = vadd.f32 %v1495_v13, %v675_v4  ;;  %v1226_v8 = vpop.f32.mrb[14].mxu1 }
 0x22f   : > { %v678_v16 = vpop.f32.mrb[15].mxu1  ;;  %v1589_v28 = vadd.f32 %v1226_v8, %v1495_v13  ;;  %v800_v32 = vmul.f32 %v1593_v31, %v1581_v18 }
 0x230   : > { %v798_v20 = vmul.f32 %v1571_v3, %v1576_v7  ;;  %v812_v23 = vadd.f32 %v811_v6, %v797_v5  ;;  %v1586_v25 = vadd.f32 %v1495_v13, %v678_v16 }
 0x231   : > { %v801_v36 = vmul.f32 %v1597_v35, %v1589_v28 }
 0x232   : > { %v813_v27 = vadd.f32 %v812_v23, %v798_v20  ;;  %v799_v29 = vmul.f32 %v1578_v14, %v1586_v25 }
 0x234   : > { %v814_v33 = vadd.f32 %v813_v27, %v799_v29 }
 0x236   : > { %v815_v38 = vadd.f32 %v814_v33, %v800_v32 }
 0x238   : > { %v816_v39 = vadd.f32 %v815_v38, %v801_v36 }
 0x23a   : > { %v817_v42 = vrot.slane %v816_v39, 4 }
 0x23c   : > { %v818_v44 = vadd.f32 %v817_v42, %v816_v39 }
 0x23e   : > { %v819_v13 = vrot.slane %v818_v44, 2 }
 0x240   : > { %v820_v46 = vadd.f32 %v819_v13, %v818_v44 }
 0x242   : > { %v821_v47 = vrot.slane %v820_v46, 1 }
 0x244   : > { %v822_v48 = vadd.f32 %v821_v47, %v820_v46 }
 0x246   : > { %v823_v49 = vmul.f32 0.03125, %v822_v48 }
 0x248   : > { %v824_v50 = vsub.f32 %v1500_v17, %v823_v49  ;;  %v825_v51 = vsub.f32 %v1508_v22, %v823_v49  ;;  %v826_v53 = vsub.f32 %v1505_v21, %v823_v49  ;;  %v827_v55 = vsub.f32 %v1513_v24, %v823_v49 }
 0x249   : > { %v828_v57 = vsub.f32 %v1526_v34, %v823_v49  ;;  %v829_v58 = vsub.f32 %v1534_v40, %v823_v49  ;;  %v830_v61 = vsub.f32 %v1529_v37, %v823_v49  ;;  %v831_v63 = vsub.f32 %v1539_v43, %v823_v49 }
 0x24a   : > { %v832_v0 = vsub.f32 %v1550_v52, %v823_v49  ;;  %v833_v1 = vsub.f32 %v1560_v59, %v823_v49  ;;  %v834_v17 = vsub.f32 %v1555_v56, %v823_v49  ;;  %v835_v22 = vsub.f32 %v1565_v62, %v823_v49 }
 0x24b   : > { %v836_v21 = vsub.f32 %v1576_v7, %v823_v49  ;;  %v837_v24 = vsub.f32 %v1586_v25, %v823_v49  ;;  %v838_v34 = vsub.f32 %v1581_v18, %v823_v49  ;;  %v839_v40 = vsub.f32 %v1589_v28, %v823_v49 }
 0x24c   : > { %v840_v37 = vmul.f32 %v824_v50, %v1486_v9  ;;  %v841_v43 = vmul.f32 %v825_v51, %v1490_v11  ;;  %v842_v52 = vmul.f32 %v826_v53, %v1488_v10  ;;  %v843_v56 = vmul.f32 %v827_v55, %v1492_v12 }
 0x24d   : > { %v844_v62 = vmul.f32 %v828_v57, %v1497_v15  ;;  %v845_v6 = vmul.f32 %v829_v58, %v1502_v19  ;;  %v846_v16 = vmul.f32 %v830_v61, %v1517_v26  ;;  %v847_v11 = vmul.f32 %v831_v63, %v1521_v30 }
 0x24e   : > { %v856_v2 = vmul.f32 %v840_v37, %v840_v37  ;;  %v857_v59 = vmul.f32 %v841_v43, %v841_v43  ;;  %v858_v4 = vmul.f32 %v842_v52, %v842_v52  ;;  %v859_v7 = vmul.f32 %v843_v56, %v843_v56 }
 0x24f   : > { %v860_v18 = vmul.f32 %v844_v62, %v844_v62  ;;  %v861_v20 = vmul.f32 %v845_v6, %v845_v6  ;;  %v848_v23 = vmul.f32 %v832_v0, %v1536_v41  ;;  %v862_v25 = vmul.f32 %v846_v16, %v846_v16 }
 0x250   : > { %v872_v5 = vadd.f32 %v857_v59, %v856_v2  ;;  %v849_v15 = vmul.f32 %v833_v1, %v1543_v45  ;;  %v863_v27 = vmul.f32 %v847_v11, %v847_v11  ;;  %v850_v19 = vmul.f32 %v834_v17, %v1552_v54 }
 0x251   : > { %v864_v29 = vmul.f32 %v848_v23, %v848_v23  ;;  %v851_v26 = vmul.f32 %v835_v22, %v1562_v60  ;;  %v852_v30 = vmul.f32 %v836_v21, %v1571_v3  ;;  %v853_v41 = vmul.f32 %v837_v24, %v1578_v14  ;;  %v1125_v24 = vld [vmem:[%s1378_s13 + $0x1] ss:$0 sm:$0xff] }
 0x252   : > { %v873_v8 = vadd.f32 %v872_v5, %v858_v4  ;;  %v865_v33 = vmul.f32 %v849_v15, %v849_v15  ;;  %v866_v38 = vmul.f32 %v850_v19, %v850_v19  ;;  %v854_v45 = vmul.f32 %v838_v34, %v1593_v31 }
 0x253   : > { %v867_v42 = vmul.f32 %v851_v26, %v851_v26  ;;  %v868_v13 = vmul.f32 %v852_v30, %v852_v30  ;;  %v855_v54 = vmul.f32 %v839_v40, %v1597_v35  ;;  %v869_v47 = vmul.f32 %v853_v41, %v853_v41 }
 0x254   : > { %v874_v9 = vadd.f32 %v873_v8, %v859_v7  ;;  %v870_v60 = vmul.f32 %v854_v45, %v854_v45  ;;  %v1634_v0 = vstv %s952_s15 }
 0x255   : > { %v871_v50 = vmul.f32 %v855_v54, %v855_v54 }
 0x256   : > { %v875_v10 = vadd.f32 %v874_v9, %v860_v18 }
 0x258   : > { %v876_v12 = vadd.f32 %v875_v10, %v861_v20 }
 0x25a   : > { %v877_v28 = vadd.f32 %v876_v12, %v862_v25 }
 0x25c   : > { %v878_v32 = vadd.f32 %v877_v28, %v863_v27 }
 0x25e   : > { %v879_v36 = vadd.f32 %v878_v32, %v864_v29 }
 0x260   : > { %v880_v39 = vadd.f32 %v879_v36, %v865_v33 }
 0x262   : > { %v881_v44 = vadd.f32 %v880_v39, %v866_v38 }
 0x264   : > { %v882_v46 = vadd.f32 %v881_v44, %v867_v42 }
 0x266   : > { %v883_v48 = vadd.f32 %v882_v46, %v868_v13 }
 0x268   : > { %v884_v49 = vadd.f32 %v883_v48, %v869_v47 }
 0x26a   : > { %v885_v51 = vadd.f32 %v884_v49, %v870_v60 }
 0x26c   : > { %v886_v3 = vadd.f32 %v885_v51, %v871_v50 }
 0x26e   : > { %v887_v53 = vrot.slane %v886_v3, 4 }
 0x270   : > { %v888_v55 = vadd.f32 %v887_v53, %v886_v3 }
 0x272   : > { %v889_v14 = vrot.slane %v888_v55, 2 }
 0x274   : > { %v890_v57 = vadd.f32 %v889_v14, %v888_v55 }
 0x276   : > { %v891_v58 = vrot.slane %v890_v57, 1 }
 0x278   : > { %v892_v61 = vadd.f32 %v891_v58, %v890_v57 }
 0x27a   : > { %v893_v31 = vmul.f32 0.03125, %v892_v61 }
 0x27c   : > { %v894_v63 = vadd.f32 1e-05, %v893_v31 }
 0x27e   : > { %1273 = vrsqrt.f32 %v894_v63 }
 0x288   : > { %v1274_v35 = vpop.eup %1273 }
 0x289   : > { %v896_v1 = vmul.f32 %v1274_v35, %v840_v37  ;;  %v897_v17 = vmul.f32 %v1274_v35, %v841_v43  ;;  %v898_v22 = vmul.f32 %v1274_v35, %v842_v52  ;;  %v899_v21 = vmul.f32 %v1274_v35, %v843_v56  ;;  %v1126_v52 = vld [vmem:[%s1378_s13 + $0x2] ss:$0 sm:$0xff] }
 0x28a   : > { %v900_v34 = vmul.f32 %v1274_v35, %v844_v62  ;;  %v901_v40 = vmul.f32 %v1274_v35, %v845_v6  ;;  %v902_v2 = vmul.f32 %v1274_v35, %v846_v16  ;;  %v903_v59 = vmul.f32 %v1274_v35, %v847_v11 }
 0x28b   : > { %v904_v4 = vmul.f32 %v1274_v35, %v848_v23  ;;  %v905_v5 = vmul.f32 %v1274_v35, %v849_v15  ;;  %v906_v7 = vmul.f32 %v1274_v35, %v850_v19  ;;  %v907_v8 = vmul.f32 %v1274_v35, %v851_v26 }
 0x28c   : > { %v908_v18 = vmul.f32 %v1274_v35, %v852_v30  ;;  %v909_v9 = vmul.f32 %v1274_v35, %v853_v41  ;;  %v910_v20 = vmul.f32 %v1274_v35, %v854_v45  ;;  %v911_v10 = vmul.f32 %v1274_v35, %v855_v54 }
 0x28d   : > { %v916_v25 = vmul.f32 %v1125_v24, %v896_v1  ;;  %v917_v12 = vmul.f32 %v1125_v24, %v897_v17  ;;  %v918_v37 = vmul.f32 %v1125_v24, %v898_v22  ;;  %v919_v43 = vmul.f32 %v1125_v24, %v899_v21 }
 0x28e   : > { %v920_v56 = vmul.f32 %v1125_v24, %v900_v34  ;;  %v921_v27 = vmul.f32 %v1125_v24, %v901_v40  ;;  %v922_v62 = vmul.f32 %v1125_v24, %v902_v2  ;;  %v923_v28 = vmul.f32 %v1125_v24, %v903_v59 }
 0x28f   : > { %v924_v6 = vmul.f32 %v1125_v24, %v904_v4  ;;  %v925_v16 = vmul.f32 %v1125_v24, %v905_v5  ;;  %v926_v11 = vmul.f32 %v1125_v24, %v906_v7  ;;  %v927_v23 = vmul.f32 %v1125_v24, %v907_v8 }
 0x290   : > { %v928_v15 = vmul.f32 %v1125_v24, %v908_v18  ;;  %v929_v19 = vmul.f32 %v1125_v24, %v909_v9  ;;  %v930_v29 = vmul.f32 %v1125_v24, %v910_v20  ;;  %v931_v32 = vmul.f32 %v1125_v24, %v911_v10 }
 0x291   : > { %v936_v26 = vadd.f32 %v1126_v52, %v916_v25  ;;  %v937_v33 = vadd.f32 %v1126_v52, %v917_v12  ;;  %v938_v36 = vadd.f32 %v1126_v52, %v918_v37  ;;  %v939_v30 = vadd.f32 %v1126_v52, %v919_v43 }
 0x292   : > { %v940_v38 = vadd.f32 %v1126_v52, %v920_v56  ;;  %v941_v39 = vadd.f32 %v1126_v52, %v921_v27  ;;  %v942_v41 = vadd.f32 %v1126_v52, %v922_v62  ;;  %v943_v42 = vadd.f32 %v1126_v52, %v923_v28 }
 0x293   : > { %v944_v44 = vadd.f32 %v1126_v52, %v924_v6  ;;  %v945_v45 = vadd.f32 %v1126_v52, %v925_v16  ;;  %v946_v13 = vadd.f32 %v1126_v52, %v926_v11  ;;  %v947_v46 = vadd.f32 %v1126_v52, %v927_v23 }
 0x294   : > { %v948_v54 = vadd.f32 %v1126_v52, %v928_v15  ;;  %v949_v47 = vadd.f32 %v1126_v52, %v929_v19  ;;  %v950_v48 = vadd.f32 %v1126_v52, %v930_v29  ;;  %v951_v60 = vadd.f32 %v1126_v52, %v931_v32 }
 0x295   : > { %vm953_vm0 = vcmp.gt.f32.partialorder %v936_v26, 0.0  ;;  %vm954_vm1 = vcmp.gt.f32.partialorder %v937_v33, 0.0  ;;  %vm955_vm2 = vcmp.gt.f32.partialorder %v938_v36, 0.0  ;;  %vm956_vm3 = vcmp.gt.f32.partialorder %v939_v30, 0.0 }
 0x296   : > { %vm957_vm4 = vcmp.gt.f32.partialorder %v940_v38, 0.0  ;;  %vm958_vm5 = vcmp.gt.f32.partialorder %v941_v39, 0.0  ;;  %vm959_vm6 = vcmp.gt.f32.partialorder %v942_v41, 0.0  ;;  %vm960_vm7 = vcmp.gt.f32.partialorder %v943_v42, 0.0 }
 0x297   : > { %vm961_vm8 = vcmp.gt.f32.partialorder %v944_v44, 0.0  ;;  %vm962_vm9 = vcmp.gt.f32.partialorder %v945_v45, 0.0  ;;  %vm963_vm10 = vcmp.gt.f32.partialorder %v946_v13, 0.0  ;;  %vm964_vm11 = vcmp.gt.f32.partialorder %v947_v46, 0.0 }
 0x298   : > { %vm965_vm12 = vcmp.gt.f32.partialorder %v948_v54, 0.0  ;;  %vm966_vm13 = vcmp.gt.f32.partialorder %v949_v47, 0.0  ;;  %vm967_vm14 = vcmp.gt.f32.partialorder %v950_v48, 0.0  ;;  %vm968_vm15 = vcmp.gt.f32.partialorder %v951_v60, 0.0 }
 0x299   : > { %v970_v49 = vmul.f32 %v1634_v0, %v936_v26  ;;  %v971_v50 = vmul.f32 %v1634_v0, %v937_v33  ;;  %v972_v51 = vmul.f32 %v1634_v0, %v938_v36  ;;  %v973_v3 = vmul.f32 %v1634_v0, %v939_v30 }
 0x29a   : > { %v974_v53 = vmul.f32 %v1634_v0, %v940_v38  ;;  %v975_v55 = vmul.f32 %v1634_v0, %v941_v39  ;;  %v976_v14 = vmul.f32 %v1634_v0, %v942_v41  ;;  %v977_v57 = vmul.f32 %v1634_v0, %v943_v42 }
 0x29b   : > { %v978_v58 = vmul.f32 %v1634_v0, %v944_v44  ;;  %v979_v61 = vmul.f32 %v1634_v0, %v945_v45  ;;  %v980_v31 = vmul.f32 %v1634_v0, %v946_v13  ;;  %v981_v63 = vmul.f32 %v1634_v0, %v947_v46 }
 0x29c   : > { %v982_v35 = vmul.f32 %v1634_v0, %v948_v54  ;;  %v983_v1 = vmul.f32 %v1634_v0, %v949_v47  ;;  %v984_v17 = vmul.f32 %v1634_v0, %v950_v48  ;;  %v985_v22 = vmul.f32 %v1634_v0, %v951_v60 }
 0x29d   : > { %v986_v21 = vsel %vm953_vm0, %v936_v26, %v970_v49  ;;  %v987_v24 = vsel %vm954_vm1, %v937_v33, %v971_v50  ;;  %v988_v34 = vsel %vm955_vm2, %v938_v36, %v972_v51  ;;  %v989_v40 = vsel %vm956_vm3, %v939_v30, %v973_v3 }
 0x29e   : > { %v990_v2 = vsel %vm957_vm4, %v940_v38, %v974_v53  ;;  %v991_v59 = vsel %vm958_vm5, %v941_v39, %v975_v55  ;;  %v992_v4 = vsel %vm959_vm6, %v942_v41, %v976_v14  ;;  %v993_v5 = vsel %vm960_vm7, %v943_v42, %v977_v57  ;;  %1022 = vst [vmem:[%s1728_s6] sm:$0xff] (!%p1127_p2), %v986_v21 }
 0x29f   : > { %v994_v7 = vsel %vm961_vm8, %v944_v44, %v978_v58  ;;  %v995_v0 = vsel %vm962_vm9, %v945_v45, %v979_v61  ;;  %v996_v8 = vsel %vm963_vm10, %v946_v13, %v980_v31  ;;  %v997_v18 = vsel %vm964_vm11, %v947_v46, %v981_v63  ;;  %1023 = vst [vmem:[%s1728_s6 + $0x8] sm:$0xff] (!%p1127_p2), %v987_v24 }
 0x2a0   : > { %v998_v9 = vsel %vm965_vm12, %v948_v54, %v982_v35  ;;  %v999_v20 = vsel %vm966_vm13, %v949_v47, %v983_v1  ;;  %v1000_v10 = vsel %vm967_vm14, %v950_v48, %v984_v17  ;;  %v1001_v25 = vsel %vm968_vm15, %v951_v60, %v985_v22  ;;  %1021 = sbr.rel (%p1127_p2) target bundleno = 685 (0x2ad), region = 56  ;;  %1024 = vst [vmem:[%s1728_s6 + $0x10] sm:$0xff] (!%p1127_p2), %v988_v34 }
 0x2a1   : > { %v1002_v12 = vpack.c.bf16 %v987_v24, %v986_v21  ;;  %v1003_v37 = vpack.c.bf16 %v989_v40, %v988_v34  ;;  %v1004_v43 = vpack.c.bf16 %v991_v59, %v990_v2  ;;  %v1005_v52 = vpack.c.bf16 %v993_v5, %v992_v4  ;;  %1025 = vst [vmem:[%s1728_s6 + $0x18] sm:$0xff] (!%p1127_p2), %v989_v40 }
 0x2a2   : > { %v1006_v56 = vpack.c.bf16 %v995_v0, %v994_v7  ;;  %v1007_v27 = vpack.c.bf16 %v997_v18, %v996_v8  ;;  %v1008_v62 = vpack.c.bf16 %v999_v20, %v998_v9  ;;  %v1009_v28 = vpack.c.bf16 %v1001_v25, %v1000_v10  ;;  %1026 = vst [vmem:[%s1728_s6 + $0x20] sm:$0xff] (!%p1127_p2), %v990_v2 }
 0x2a3   : > { %1010 = vst [vmem:[#allocation2] sm:$0xff] %v1002_v12  ;;  %1011 = vst [vmem:[#allocation2 + $0x8] sm:$0xff] %v1003_v37 }
 0x2a4   : > { %1012 = vst [vmem:[#allocation2 + $0x10] sm:$0xff] %v1004_v43  ;;  %1013 = vst [vmem:[#allocation2 + $0x18] sm:$0xff] %v1005_v52 }
 0x2a5   : > { %1014 = vst [vmem:[#allocation2 + $0x20] sm:$0xff] %v1006_v56  ;;  %1015 = vst [vmem:[#allocation2 + $0x28] sm:$0xff] %v1007_v27 }
 0x2a6   : > { %1016 = vst [vmem:[#allocation2 + $0x30] sm:$0xff] %v1008_v62  ;;  %1017 = vst [vmem:[#allocation2 + $0x38] sm:$0xff] %v1009_v28 }
 0x2a7   : > { %1027 = vst [vmem:[%s1728_s6 + $0x28] sm:$0xff] %v991_v59  ;;  %1028 = vst [vmem:[%s1728_s6 + $0x30] sm:$0xff] %v992_v4 }
 0x2a8   : > { %1029 = vst [vmem:[%s1728_s6 + $0x38] sm:$0xff] %v993_v5  ;;  %1030 = vst [vmem:[%s1728_s6 + $0x40] sm:$0xff] %v994_v7 }
 0x2a9   : > { %1031 = vst [vmem:[%s1728_s6 + $0x48] sm:$0xff] %v995_v0  ;;  %1032 = vst [vmem:[%s1728_s6 + $0x50] sm:$0xff] %v996_v8 }
 0x2aa   : > { %1033 = vst [vmem:[%s1728_s6 + $0x58] sm:$0xff] %v997_v18  ;;  %1034 = vst [vmem:[%s1728_s6 + $0x60] sm:$0xff] %v998_v9 }
 0x2ab   : > { %1035 = vst [vmem:[%s1728_s6 + $0x68] sm:$0xff] %v999_v20  ;;  %1036 = vst [vmem:[%s1728_s6 + $0x70] sm:$0xff] %v1000_v10 }
 0x2ac   : > { %1037 = vst [vmem:[%s1728_s6 + $0x78] sm:$0xff] %v1001_v25 }
 0x2ad PF: > { %s17_s21 = sadd.s32 1, %s1300_s21  }
 0x2ae   : > { %p14_p3 = scmp.ge.s32.totalorder %s17_s21, 4  }
 0x2b0   :  { %16 = sbr.rel (!%p14_p3) target bundleno = 1 (0x1), region = 86 }
 0x2b7   :  { %1049 = vsyncpa [#allocation4], 1 }
 0x2b8   :  { %1051 = vsyncpa [#allocation4 + $0x1], 1 }

</bundles_post_ra>
